<compile_context>
chip_gen: v5e
topology: v5e:2x2
jax: 0.10.0
libtpu: 0.0.40
codegen_flags: <defaults>
</compile_context>

<pallas_src>
import functools

import jax
import jax.numpy as jnp
from jax.experimental import pallas as pl
from jax.experimental.pallas import tpu as pltpu


def _round_up(x, m):
    return ((x + m - 1) // m) * m


def _lora_kernel(x_ref, wd_ref, wu_ref, o_ref, h_ref):
    # x_ref : (tm, in_features)      activation tile (compute dtype)
    # wd_ref: (in_features, rank)    down-projection (transposed), resident
    # wu_ref: (rank, tn)             up-projection tile (transposed), resident
    # o_ref : (tm, tn)               output tile
    # h_ref : (tm, rank) f32         VMEM scratch for the low-rank intermediate
    x = x_ref[...]
    h_ref[...] = jnp.dot(x, wd_ref[...], preferred_element_type=jnp.float32)
    o_ref[...] = jnp.dot(h_ref[...].astype(wu_ref.dtype), wu_ref[...],
                         preferred_element_type=jnp.float32
                         ).astype(o_ref.dtype)


@functools.partial(jax.jit, static_argnames=("tm", "tn"))
def lora_linear(hidden_states, w_down_t, w_up_t, *, tm=256, tn=2048):
    """LoRA linear forward.

    hidden_states: (B, S, in_features)   activations, any float dtype
    w_down_t     : (in_features, rank)   = down.weight.T
    w_up_t       : (rank, out_features)  = up.weight.T
    returns      : (B, S, out_features)  in hidden_states.dtype
    """
    orig_dtype = hidden_states.dtype
    B, S, in_features = hidden_states.shape
    rank, out_features = w_up_t.shape
    assert w_down_t.shape == (in_features, rank)
    M = B * S

    # Compute dtype = activation dtype.  Casting the (tiny) weights instead of
    # the activations avoids an extra full HBM pass over x and halves the x
    # DMA bytes when activations are bf16; accumulation stays f32 in-kernel.
    compute_dtype = orig_dtype
    wd = w_down_t.astype(compute_dtype)
    wu = w_up_t.astype(compute_dtype)

    x2d = hidden_states.reshape(M, in_features)

    # Row tile: big tiles amortize the ~0.35us/step overhead and fill the MXU
    # rows; pad M up to a multiple of the (8-aligned) effective tile.
    tm_eff = min(int(tm), _round_up(M, 8))
    m_pad = _round_up(M, tm_eff)
    if m_pad != M:
        x2d = jnp.pad(x2d, ((0, m_pad - M), (0, 0)))

    # Optional out_features tiling (only when it tiles cleanly & is large);
    # keeps the (tm, tn) output tile small enough for v7x's 64 MiB VMEM
    # without shrinking tm.  Otherwise use the full out_features as one block.
    if out_features >= 2 * tn and out_features % tn == 0:
        tn_eff = int(tn)
    else:
        tn_eff = out_features
    grid = (m_pad // tm_eff, out_features // tn_eff)

    itemsize = jnp.dtype(compute_dtype).itemsize
    out_itemsize = jnp.dtype(orig_dtype).itemsize

    # Advisory cost: helps XLA schedule neighbours around this mem-bound call.
    cost = pl.CostEstimate(
        flops=2 * M * rank * (in_features + out_features),
        transcendentals=0,
        bytes_accessed=(M * in_features * itemsize
                        + M * out_features * out_itemsize
                        + (in_features * rank + rank * out_features) * itemsize),
    )

    # VMEM budget: double-buffered x / out tiles + (double-buffer-allocated)
    # resident weights + f32 h scratch, with ~25% headroom.
    vmem_need = (2 * tm_eff * in_features * itemsize
                 + 2 * tm_eff * tn_eff * out_itemsize
                 + 2 * (in_features * rank + rank * tn_eff) * itemsize
                 + tm_eff * max(rank, 128) * 4)
    vmem_limit = int(min(max(vmem_need * 5 // 4, 32 * 1024 * 1024),
                         100 * 1024 * 1024))

    out2d = pl.pallas_call(
        _lora_kernel,
        out_shape=jax.ShapeDtypeStruct((m_pad, out_features), orig_dtype),
        grid_spec=pltpu.PrefetchScalarGridSpec(
            num_scalar_prefetch=0,
            grid=grid,
            in_specs=[
                # x tile: block index only depends on i -> not re-DMA'd per j.
                pl.BlockSpec((tm_eff, in_features), lambda i, j: (i, 0)),
                # Weights: constant / j-only block index -> stay resident.
                pl.BlockSpec((in_features, rank), lambda i, j: (0, 0)),
                pl.BlockSpec((rank, tn_eff), lambda i, j: (0, j)),
            ],
            out_specs=pl.BlockSpec((tm_eff, tn_eff), lambda i, j: (i, j)),
            scratch_shapes=[pltpu.VMEM((tm_eff, rank), jnp.float32)],
        ),
        compiler_params=pltpu.CompilerParams(
            dimension_semantics=("parallel", "parallel"),
            vmem_limit_bytes=vmem_limit,
        ),
        cost_estimate=cost,
    )(x2d, wd, wu)

    if m_pad != M:
        out2d = out2d[:M]
    return out2d.reshape(B, S, out_features)


def init_lora_params(key, in_features, out_features, rank, dtype=jnp.float32):
    """Deterministic parameter init matching the PyTorch module:
    down.weight ~ Normal(0, 1/rank), up.weight = 0."""
    if rank > min(in_features, out_features):
        raise ValueError(
            f"LoRA rank {rank} must be less or equal than "
            f"{min(in_features, out_features)}")
    # nn.Linear weight shape is (out, in); we keep the transposed layout.
    down_w = (jax.random.normal(key, (rank, in_features), dtype=jnp.float32)
              * (1.0 / rank)).astype(dtype)              # (rank, in_features)
    up_w = jnp.zeros((out_features, rank), dtype=dtype)  # (out_features, rank)
    return down_w.T, up_w.T   # (in_features, rank), (rank, out_features)


def _ref_forward(hidden_states, w_down_t, w_up_t):
    # Pure-JAX reference (module semantics: compute in weight dtype / f32).
    return (hidden_states.astype(jnp.float32)
            @ w_down_t.astype(jnp.float32)
            @ w_up_t.astype(jnp.float32)).astype(hidden_states.dtype)


if __name__ == "__main__":
    key = jax.random.PRNGKey(0)
    k_x, k_w = jax.random.split(key)

    B, S = 2, 8
    in_features, out_features, rank = 32, 32, 4

    # orig_dtype = bfloat16, weight dtype = float32 (exercises the dtype
    # round-trip in the module's forward).
    hidden_states = jax.random.normal(
        k_x, (B, S, in_features), dtype=jnp.float32).astype(jnp.bfloat16)
    w_down_t, w_up_t = init_lora_params(
        k_w, in_features, out_features, rank, dtype=jnp.float32)

    # 1) Freshly-initialized module (up weight = 0 -> output = 0).
    out = jax.block_until_ready(lora_linear(hidden_states, w_down_t, w_up_t))
    ref = _ref_forward(hidden_states, w_down_t, w_up_t)
    assert out.shape == (B, S, out_features)
    assert out.dtype == hidden_states.dtype
    assert jnp.allclose(out.astype(jnp.float32), ref.astype(jnp.float32),
                        atol=1e-2, rtol=1e-2)

    # 2) Non-zero up weight: exercises both matmuls for real.
    w_up_t_nz = jax.random.normal(
        jax.random.PRNGKey(1), w_up_t.shape, dtype=jnp.float32) * 0.05
    out_nz = jax.block_until_ready(
        lora_linear(hidden_states, w_down_t, w_up_t_nz))
    ref_nz = _ref_forward(hidden_states, w_down_t, w_up_t_nz)
    assert jnp.allclose(out_nz.astype(jnp.float32), ref_nz.astype(jnp.float32),
                        atol=1e-2, rtol=1e-2)

    # 3) Non-divisible B*S: exercises the cdiv + zero-padded last row tile.
    hs_odd = jax.random.normal(
        jax.random.PRNGKey(2), (3, 5, in_features), dtype=jnp.float32
    ).astype(jnp.bfloat16)
    out_odd = jax.block_until_ready(
        lora_linear(hs_odd, w_down_t, w_up_t_nz))
    ref_odd = _ref_forward(hs_odd, w_down_t, w_up_t_nz)
    assert out_odd.shape == (3, 5, out_features)
    assert jnp.allclose(out_odd.astype(jnp.float32),
                        ref_odd.astype(jnp.float32), atol=1e-2, rtol=1e-2)

    print("KERNEL_OK")
</pallas_src>

<mosaic_0001>
module attributes {stable_mosaic.version = 11 : i64} {
  func.func @_lora_kernel(%arg0: i32, %arg1: i32, %arg2: memref<16x32xbf16, #tpu.memory_space<vmem>>, %arg3: memref<32x4xbf16, #tpu.memory_space<vmem>>, %arg4: memref<4x32xbf16, #tpu.memory_space<vmem>>, %arg5: memref<16x32xbf16, #tpu.memory_space<vmem>>, %arg6: memref<16x4xf32, #tpu.memory_space<vmem>>) attributes {dimension_semantics = [#tpu.dimension_semantics<parallel>, #tpu.dimension_semantics<parallel>], iteration_bounds = array<i64: 1, 1>, scalar_prefetch = 0 : i64, scratch_operands = 1 : i64, tpu.core_type = #tpu.core_type<tc>, window_params = [{transform_indices = @transform_0, window_bounds = array<i64: 16, 32>}, {pipeline_mode = #tpu.pipeline_mode<synchronous>, transform_indices = @transform_1, window_bounds = array<i64: 32, 4>}, {transform_indices = @transform_2, window_bounds = array<i64: 4, 32>}, {transform_indices = @transform_3, window_bounds = array<i64: 16, 32>}]} {
    %c0 = arith.constant 0 : index
    %c0_0 = arith.constant 0 : index
    %0 = vector.load %arg2[%c0, %c0_0] : memref<16x32xbf16, #tpu.memory_space<vmem>>, vector<16x32xbf16>
    %c0_1 = arith.constant 0 : index
    %c0_2 = arith.constant 0 : index
    %1 = vector.load %arg3[%c0_1, %c0_2] : memref<32x4xbf16, #tpu.memory_space<vmem>>, vector<32x4xbf16>
    %cst = arith.constant dense<0.000000e+00> : vector<16x4xf32>
    %2 = tpu.matmul %0, %1, %cst {dimension_numbers = #tpu.dot_dimension_numbers<[1], [0], [0], [1], [0, 0, 1, 1], [], []>} : vector<16x32xbf16>, vector<32x4xbf16>, vector<16x4xf32> -> vector<16x4xf32>
    %c0_3 = arith.constant 0 : index
    %c0_4 = arith.constant 0 : index
    %3 = vector.load %arg6[%c0_3, %c0_4] : memref<16x4xf32, #tpu.memory_space<vmem>>, vector<16x4xf32>
    tpu.vector_store %arg6[%c0_3, %c0_4], %2 {strides = array<i32>} : memref<16x4xf32, #tpu.memory_space<vmem>>, vector<16x4xf32>,
    %c0_5 = arith.constant 0 : index
    %c0_6 = arith.constant 0 : index
    %4 = vector.load %arg6[%c0_5, %c0_6] : memref<16x4xf32, #tpu.memory_space<vmem>>, vector<16x4xf32>
    %5 = arith.truncf %4 : vector<16x4xf32> to vector<16x4xbf16>
    %c0_7 = arith.constant 0 : index
    %c0_8 = arith.constant 0 : index
    %6 = vector.load %arg4[%c0_7, %c0_8] : memref<4x32xbf16, #tpu.memory_space<vmem>>, vector<4x32xbf16>
    %cst_9 = arith.constant dense<0.000000e+00> : vector<16x32xf32>
    %7 = tpu.matmul %5, %6, %cst_9 {dimension_numbers = #tpu.dot_dimension_numbers<[1], [0], [0], [1], [0, 0, 1, 1], [], []>} : vector<16x4xbf16>, vector<4x32xbf16>, vector<16x32xf32> -> vector<16x32xf32>
    %8 = arith.truncf %7 : vector<16x32xf32> to vector<16x32xbf16>
    %c0_10 = arith.constant 0 : index
    %c0_11 = arith.constant 0 : index
    %9 = vector.load %arg5[%c0_10, %c0_11] : memref<16x32xbf16, #tpu.memory_space<vmem>>, vector<16x32xbf16>
    tpu.vector_store %arg5[%c0_10, %c0_11], %8 {strides = array<i32>} : memref<16x32xbf16, #tpu.memory_space<vmem>>, vector<16x32xbf16>,
    return
  }
  func.func @transform_0(%arg0: i32, %arg1: i32) -> (i32, i32) {
    %c0_i32 = arith.constant 0 : i32
    %c0_i32_0 = arith.constant 0 : i32
    return %arg0, %c0_i32 : i32, i32
  }
  func.func @transform_1(%arg0: i32, %arg1: i32) -> (i32, i32) {
    %c0_i32 = arith.constant 0 : i32
    %c0_i32_0 = arith.constant 0 : i32
    %c0_i32_1 = arith.constant 0 : i32
    return %c0_i32, %c0_i32_0 : i32, i32
  }
  func.func @transform_2(%arg0: i32, %arg1: i32) -> (i32, i32) {
    %c0_i32 = arith.constant 0 : i32
    %c0_i32_0 = arith.constant 0 : i32
    return %c0_i32, %arg1 : i32, i32
  }
  func.func @transform_3(%arg0: i32, %arg1: i32) -> (i32, i32) {
    %c0_i32 = arith.constant 0 : i32
    return %arg0, %arg1 : i32, i32
  }
}

</mosaic_0001>

<bundles_post_ra>
// kernel: lora_linear.1
= control target key start
LH: loop header
LB: loop body
LE: loop exit
PB: predicated region body
PF: predicated region fallthrough
CT: control target
= control target key end

     0   :  { %s192_s0 = inlined_call_operand.vmem [shape: bf16[16,32], index: 0, kind: input, shape index: {}]   ;;  %s193_s1 = inlined_call_operand.vmem [shape: bf16[32,4], index: 1, kind: input, shape index: {}]   ;;  %s194_s2 = inlined_call_operand.vmem [shape: bf16[4,32], index: 2, kind: input, shape index: {}]   ;;  %s195_s3 = inlined_call_operand.hbm [shape: bf16[16,32], index: 3, kind: output, shape index: {}]  }
   0x1   :  { %v124_v0 = vld [vmem:[%s193_s1 + $0x8] sm:$0xff] }
   0x2   :  { %8 = vsyncpa [#allocation4], 0  ;;  %49 = vmatpush.bf16.msra.mxu0 %v124_v0  ;;  %v123_v1 = vld [vmem:[%s193_s1] sm:$0xff]  ;;  %vm39_vm0 = vcmask 261120   ;;  %vm67_vm1 = vcmask 1041408   ;;  %vm57_vm2 = vcmask 31744  }
   0x3   :  { %v122_v2 = vld [vmem:[%s192_s0] sm:$0xff]  ;;  %vm87_vm3 = vcmask 257024   ;;  %s154_s0 = smov [#allocation3]   ;;  %s96_s21 = sshll.u32 %s195_s3, 4  ;;  %s97_s21 = int_to_ptr.hbm [resolvable:$true] %s96_s21 }
   0x4   :  { %v63_v3 = vld [vmem:[%s194_s2] sm:$0x3]  ;;  %s94_s1 = sshll.u32 %s154_s0, 4  ;;  %s155_s22 = smov 64   ;;  %s95_s1 = int_to_ptr.vmem [resolvable:$true] %s94_s1 }
   0x5   :  { %v69_v4 = vsel %vm67_vm1, %v63_v3, 0  ;;  %s156_s23 = smov 4  }
   0x6   :  { %50 = vmatpush.bf16.msra.mxu0 %v123_v1  ;;  %78 = vmatpush.bf16.msra.mxu1 %v69_v4 }
   0x9   :  { %120 = vmatmul.msk.bf16.vlgmr.msra.gmra.mxu0 %vm39_vm0, %v122_v2 }
  0x86   :  { %v52_v5 = vpop.f32.mrf.mxu0 }
  0x87   :  { %58 = vst.msk [vmem:[#allocation2] sm:$0xff] %vm57_vm2, %v52_v5 }
  0x8e   :  { %v54_v6 = vpop.f32.mrf.mxu0  ;;  %v60_v7 = vld [vmem:[#allocation2] sm:$0xff] }
  0x8f   :  { %59 = vst.msk [vmem:[#allocation2 + $0x8] sm:$0xff] %vm57_vm2, %v54_v6 }
  0x96   :  { %v61_v8 = vld [vmem:[#allocation2 + $0x8] sm:$0xff] }
  0x97   :  { %v62_v9 = vpack.c.bf16 %v61_v8, %v60_v7 }
  0x99   :  { %121 = vmatmul.msk.bf16.vlgmr.msra.gmra.mxu1 %vm57_vm2, %v62_v9 }
 0x116   :  { %v80_v10 = vpop.f32.mrf.mxu1 }
 0x117   :  { %v85_v11 = vpack.c.bf16 %v80_v10, %v80_v10 }
 0x119   :  { %88 = vst.msk [vmem:[#allocation3] sm:$0xf] %vm87_vm3, %v85_v11 }
 0x11e   :  { %v82_v12 = vpop.f32.mrf.mxu1 }
 0x11f   :  { %v86_v13 = vpack.c.bf16 %v82_v12, %v82_v12 }
 0x121   :  { %89 = vst.msk [vmem:[#allocation3 + $0x4] sm:$0xf] %vm87_vm3, %v86_v13 }
 0x122   :  { %102 = dma.vmem_to_hbm [thread:$0]  %s95_s1, 128, %s97_s21, [#allocation4], %s155_s22, %s155_s22, %s156_s23  }
 0x123   :  { %152 = dma.done.wait [#allocation4], 128  }
 0x124   :  { %153 = vsyncadd [#allocation4], 4294967168 }
 0x125   :  { %107 = vsyncpa [#allocation4], 1 }

</bundles_post_ra>
